<compile_context>
chip_gen: v7x
topology: tpu7x:2x2x1
jax: 0.10.0
libtpu: 0.0.40
codegen_flags: <defaults>
</compile_context>

<pallas_src>
import math

import jax
import jax.numpy as jnp
from jax.experimental import pallas as pl
from jax.experimental.pallas import tpu as pltpu


_GELU_C0 = math.sqrt(2.0 / math.pi)
_GELU_C1 = 0.044715 * _GELU_C0

# Scoped-VMEM hard limit: safely under v7x's 64 MiB physical VMEM (and far
# under v5e/v6e's 128 MiB).  Tile-size selection targets _VMEM_BUDGET_BYTES so
# there is headroom below the hard limit.
_VMEM_LIMIT_BYTES = 56 * 1024 * 1024
_VMEM_BUDGET_BYTES = 44 * 1024 * 1024


def _gelu_new(x):
    # 0.5 * x * (1 + tanh(sqrt(2/pi) * (x + 0.044715 * x^3)))
    # refactored as x * (C0 + C1*x*x) inside tanh (one fewer multiply).
    inner = x * (_GELU_C0 + _GELU_C1 * x * x)
    return 0.5 * x * (1.0 + jnp.tanh(inner))


def _round_up(n, m):
    return ((n + m - 1) // m) * m


def _choose_tm(M, tm_target):
    """Row tile: large for MXU/arith-intensity, but >=2 tiles when possible so
    the 'parallel' row axis can shard across v7x's two TensorCores."""
    tm = min(tm_target, _round_up(M, 8))
    if pl.cdiv(M, tm) < 2 and M > 8:
        tm = max(8, _round_up(pl.cdiv(M, 2), 8))
    return tm


def _choose_tk(d_mlp, tk_target):
    """Largest lane-aligned (multiple-of-128) divisor of d_mlp <= target."""
    assert d_mlp % 128 == 0, "d_mlp must be a multiple of 128 for the streaming path"
    tk = max(128, min(tk_target, d_mlp))
    tk = (tk // 128) * 128
    while d_mlp % tk != 0:
        tk -= 128
    return tk


def _resident_vmem_bytes(d_model, d_mlp, tm):
    f32, bf16 = 4, 2
    return (2 * d_model * d_mlp * bf16 * 2          # W_in + W_out (double-buffered)
            + tm * d_model * f32 * 2                # x tile
            + tm * d_model * f32 * 2                # out tile
            + tm * d_mlp * (f32 + bf16)             # pre (f32) + post (bf16) temporaries
            + (d_mlp + d_model) * f32 * 2)          # biases


def _stream_vmem_bytes(d_model, tm, tk):
    f32, bf16 = 4, 2
    return (tm * d_model * f32 * 2                  # x tile
            + d_model * tk * bf16 * 2               # W_in slice
            + tk * d_model * bf16 * 2               # W_out slice
            + tm * d_model * f32                    # f32 accumulator scratch
            + tm * d_model * f32 * 2                # out tile
            + tm * tk * (f32 + bf16)                # pre/post temporaries
            + (tk + d_model) * f32 * 2)             # bias slices


# --------------------------------------------------------------------------
# Kernels
# --------------------------------------------------------------------------
def _mlp_resident_kernel(x_ref, w_in_ref, b_in_ref, w_out_ref, b_out_ref, o_ref):
    # Weights/biases are VMEM-resident (constant index_map); only x/out stream.
    x = x_ref[...].astype(jnp.bfloat16)                       # in-kernel cast
    pre = jnp.dot(x, w_in_ref[...], preferred_element_type=jnp.float32)
    pre = pre + b_in_ref[...]                                  # f32 bias add
    post = _gelu_new(pre)                                      # f32 GeLU
    out = jnp.dot(post.astype(jnp.bfloat16), w_out_ref[...],
                  preferred_element_type=jnp.float32)
    o_ref[...] = (out + b_out_ref[...]).astype(o_ref.dtype)


def _mlp_stream_kernel(x_ref, w_in_ref, b_in_ref, w_out_ref, b_out_ref, o_ref,
                       acc_ref):
    k = pl.program_id(1)

    @pl.when(k == 0)
    def _():
        acc_ref[...] = jnp.zeros_like(acc_ref)

    x = x_ref[...].astype(jnp.bfloat16)                        # in-kernel cast
    pre = jnp.dot(x, w_in_ref[...], preferred_element_type=jnp.float32)
    pre = pre + b_in_ref[...]
    post = _gelu_new(pre)
    acc_ref[...] += jnp.dot(post.astype(jnp.bfloat16), w_out_ref[...],
                            preferred_element_type=jnp.float32)

    @pl.when(k == pl.num_programs(1) - 1)
    def _():
        o_ref[...] = (acc_ref[...] + b_out_ref[...]).astype(o_ref.dtype)


# --------------------------------------------------------------------------
# Wrapper
# --------------------------------------------------------------------------
def mlp_forward(x, w_in, b_in, w_out, b_out, *, tm=512, tk=512):
    """x: [batch, posn, d_model] f32 -> [batch, posn, d_model] f32.

    For best performance pass w_in / w_out already cast to bf16 (cast once at
    init); f32 weights are accepted and cast here as a fallback.
    """
    batch, posn, d_model = x.shape
    d_mlp = w_in.shape[1]
    M = batch * posn

    w_in_b = w_in if w_in.dtype == jnp.bfloat16 else w_in.astype(jnp.bfloat16)
    w_out_b = w_out if w_out.dtype == jnp.bfloat16 else w_out.astype(jnp.bfloat16)
    b_in2 = b_in.reshape(1, d_mlp).astype(jnp.float32)
    b_out2 = b_out.reshape(1, d_model).astype(jnp.float32)
    x2 = x.reshape(M, d_model)            # stays f32; cast to bf16 in-kernel

    tm = _choose_tm(M, tm)

    # ---------------- resident-weights path --------------------------------
    tm_r = tm
    while tm_r > 8 and _resident_vmem_bytes(d_model, d_mlp, tm_r) > _VMEM_BUDGET_BYTES:
        tm_r = max(8, _round_up(tm_r // 2, 8))

    if _resident_vmem_bytes(d_model, d_mlp, tm_r) <= _VMEM_BUDGET_BYTES:
        n_rows = pl.cdiv(M, tm_r)
        out2 = pl.pallas_call(
            _mlp_resident_kernel,
            out_shape=jax.ShapeDtypeStruct((M, d_model), jnp.float32),
            grid_spec=pltpu.PrefetchScalarGridSpec(
                num_scalar_prefetch=0,
                grid=(n_rows,),
                in_specs=[
                    pl.BlockSpec((tm_r, d_model), lambda i: (i, 0)),    # x rows
                    pl.BlockSpec((d_model, d_mlp), lambda i: (0, 0)),   # W_in (resident)
                    pl.BlockSpec((1, d_mlp), lambda i: (0, 0)),         # b_in (resident)
                    pl.BlockSpec((d_mlp, d_model), lambda i: (0, 0)),   # W_out (resident)
                    pl.BlockSpec((1, d_model), lambda i: (0, 0)),       # b_out (resident)
                ],
                out_specs=pl.BlockSpec((tm_r, d_model), lambda i: (i, 0)),
            ),
            compiler_params=pltpu.CompilerParams(
                dimension_semantics=("parallel",),
                vmem_limit_bytes=_VMEM_LIMIT_BYTES,
            ),
        )(x2, w_in_b, b_in2, w_out_b, b_out2)
        return out2.reshape(batch, posn, d_model)

    # ---------------- streaming fallback (weights too large) ---------------
    tk = _choose_tk(d_mlp, tk)
    while _stream_vmem_bytes(d_model, tm, tk) > _VMEM_BUDGET_BYTES and tk > 128:
        tk = _choose_tk(d_mlp, tk // 2)
    while _stream_vmem_bytes(d_model, tm, tk) > _VMEM_BUDGET_BYTES and tm > 8:
        tm = max(8, _round_up(tm // 2, 8))
    # TODO(synk): for very large d_model, additionally tile the output
    # (d_model) axis instead of only shrinking tm/tk.

    n_rows = pl.cdiv(M, tm)
    out2 = pl.pallas_call(
        _mlp_stream_kernel,
        out_shape=jax.ShapeDtypeStruct((M, d_model), jnp.float32),
        grid_spec=pltpu.PrefetchScalarGridSpec(
            num_scalar_prefetch=0,
            grid=(n_rows, d_mlp // tk),                         # reduction last
            in_specs=[
                pl.BlockSpec((tm, d_model), lambda i, k: (i, 0)),   # x rows (not re-fetched per k)
                pl.BlockSpec((d_model, tk), lambda i, k: (0, k)),   # W_in slice
                pl.BlockSpec((1, tk), lambda i, k: (0, k)),         # b_in slice
                pl.BlockSpec((tk, d_model), lambda i, k: (k, 0)),   # W_out slice
                pl.BlockSpec((1, d_model), lambda i, k: (0, 0)),    # b_out
            ],
            out_specs=pl.BlockSpec((tm, d_model), lambda i, k: (i, 0)),
            scratch_shapes=[pltpu.VMEM((tm, d_model), jnp.float32)],
        ),
        compiler_params=pltpu.CompilerParams(
            dimension_semantics=("parallel", "arbitrary"),
            vmem_limit_bytes=_VMEM_LIMIT_BYTES,
        ),
    )(x2, w_in_b, b_in2, w_out_b, b_out2)
    return out2.reshape(batch, posn, d_model)


# --------------------------------------------------------------------------
# Reference + test
# --------------------------------------------------------------------------
def mlp_reference(x, w_in, b_in, w_out, b_out):
    pre = jnp.einsum("bpd,dm->bpm", x, w_in) + b_in
    post = 0.5 * pre * (1.0 + jnp.tanh(_GELU_C0 * (pre + 0.044715 * pre ** 3)))
    return jnp.einsum("bpm,md->bpd", post, w_out) + b_out


if __name__ == "__main__":
    # Small config consistent with the module (d_mlp = 4 * d_model).
    batch, posn, d_model, d_mlp = 2, 8, 128, 512
    init_range = 0.02

    key = jax.random.PRNGKey(0)
    kx, kwin, kwout, kx2 = jax.random.split(key, 4)

    x = jax.random.normal(kx, (batch, posn, d_model), dtype=jnp.float32)
    W_in = init_range * jax.random.normal(kwin, (d_model, d_mlp), dtype=jnp.float32)
    W_out = init_range * jax.random.normal(kwout, (d_mlp, d_model), dtype=jnp.float32)
    b_in = jnp.zeros((d_mlp,), dtype=jnp.float32)
    b_out = jnp.zeros((d_model,), dtype=jnp.float32)

    # Pre-cast weights to bf16 once (per review: don't pay the cast per call).
    W_in_b = W_in.astype(jnp.bfloat16)
    W_out_b = W_out.astype(jnp.bfloat16)

    out = jax.block_until_ready(mlp_forward(x, W_in_b, b_in, W_out_b, b_out))
    ref = mlp_reference(x, W_in, b_in, W_out, b_out)
    assert out.shape == (batch, posn, d_model)
    # bf16 matmul operands (f32 accumulation) -> loosened tolerance vs f32 ref.
    assert jnp.allclose(out, ref, atol=2e-2, rtol=2e-2), "mismatch vs reference"

    # Second check: rows not divisible by the row tile (exercises the partial
    # last block / masked-store path, no padding copy needed).
    x_odd = jax.random.normal(kx2, (2, 5, d_model), dtype=jnp.float32)
    out_odd = jax.block_until_ready(mlp_forward(x_odd, W_in_b, b_in, W_out_b, b_out))
    ref_odd = mlp_reference(x_odd, W_in, b_in, W_out, b_out)
    assert jnp.allclose(out_odd, ref_odd, atol=2e-2, rtol=2e-2), "mismatch (partial block)"

    print("KERNEL_OK")
</pallas_src>

<mosaic_0001>
module attributes {stable_mosaic.version = 11 : i64} {
  func.func @_mlp_resident_kernel(%arg0: i32, %arg1: memref<8x128xf32, #tpu.memory_space<vmem>>, %arg2: memref<128x512xbf16, #tpu.memory_space<vmem>>, %arg3: memref<1x512xf32, #tpu.memory_space<vmem>>, %arg4: memref<512x128xbf16, #tpu.memory_space<vmem>>, %arg5: memref<1x128xf32, #tpu.memory_space<vmem>>, %arg6: memref<8x128xf32, #tpu.memory_space<vmem>>) attributes {dimension_semantics = [#tpu.dimension_semantics<parallel>], iteration_bounds = array<i64: 2>, scalar_prefetch = 0 : i64, scratch_operands = 0 : i64, tpu.core_type = #tpu.core_type<tc>, window_params = [{transform_indices = @transform_0, window_bounds = array<i64: 8, 128>}, {pipeline_mode = #tpu.pipeline_mode<synchronous>, transform_indices = @transform_1, window_bounds = array<i64: 128, 512>}, {pipeline_mode = #tpu.pipeline_mode<synchronous>, transform_indices = @transform_2, window_bounds = array<i64: 1, 512>}, {pipeline_mode = #tpu.pipeline_mode<synchronous>, transform_indices = @transform_3, window_bounds = array<i64: 512, 128>}, {pipeline_mode = #tpu.pipeline_mode<synchronous>, transform_indices = @transform_4, window_bounds = array<i64: 1, 128>}, {transform_indices = @transform_5, window_bounds = array<i64: 8, 128>}]} {
    %c0 = arith.constant 0 : index
    %c0_0 = arith.constant 0 : index
    %0 = vector.load %arg1[%c0, %c0_0] : memref<8x128xf32, #tpu.memory_space<vmem>>, vector<8x128xf32>
    %1 = arith.truncf %0 : vector<8x128xf32> to vector<8x128xbf16>
    %c0_1 = arith.constant 0 : index
    %c0_2 = arith.constant 0 : index
    %2 = vector.load %arg2[%c0_1, %c0_2] : memref<128x512xbf16, #tpu.memory_space<vmem>>, vector<128x512xbf16>
    %cst = arith.constant dense<0.000000e+00> : vector<8x512xf32>
    %3 = tpu.matmul %1, %2, %cst {dimension_numbers = #tpu.dot_dimension_numbers<[1], [0], [0], [1], [0, 0, 1, 1], [], []>} : vector<8x128xbf16>, vector<128x512xbf16>, vector<8x512xf32> -> vector<8x512xf32>
    %c0_3 = arith.constant 0 : index
    %c0_4 = arith.constant 0 : index
    %4 = vector.load %arg3[%c0_3, %c0_4] : memref<1x512xf32, #tpu.memory_space<vmem>>, vector<1x512xf32>
    %5 = vector.broadcast %4 : vector<1x512xf32> to vector<8x512xf32>
    %6 = arith.addf %3, %5 : vector<8x512xf32>
    %cst_5 = arith.constant 0.0356774069 : f32
    %7 = vector.broadcast %cst_5 : f32 to vector<8x512xf32>
    %8 = arith.mulf %7, %6 : vector<8x512xf32>
    %9 = arith.mulf %8, %6 : vector<8x512xf32>
    %cst_6 = arith.constant 0.797884583 : f32
    %10 = vector.broadcast %cst_6 : f32 to vector<8x512xf32>
    %11 = arith.addf %10, %9 : vector<8x512xf32>
    %12 = arith.mulf %6, %11 : vector<8x512xf32>
    %cst_7 = arith.constant 5.000000e-01 : f32
    %13 = vector.broadcast %cst_7 : f32 to vector<8x512xf32>
    %14 = arith.mulf %13, %6 : vector<8x512xf32>
    %15 = math.tanh %12 : vector<8x512xf32>
    %cst_8 = arith.constant 1.000000e+00 : f32
    %16 = vector.broadcast %cst_8 : f32 to vector<8x512xf32>
    %17 = arith.addf %16, %15 : vector<8x512xf32>
    %18 = arith.mulf %14, %17 : vector<8x512xf32>
    %19 = arith.truncf %18 : vector<8x512xf32> to vector<8x512xbf16>
    %c0_9 = arith.constant 0 : index
    %c0_10 = arith.constant 0 : index
    %20 = vector.load %arg4[%c0_9, %c0_10] : memref<512x128xbf16, #tpu.memory_space<vmem>>, vector<512x128xbf16>
    %cst_11 = arith.constant dense<0.000000e+00> : vector<8x128xf32>
    %21 = tpu.matmul %19, %20, %cst_11 {dimension_numbers = #tpu.dot_dimension_numbers<[1], [0], [0], [1], [0, 0, 1, 1], [], []>} : vector<8x512xbf16>, vector<512x128xbf16>, vector<8x128xf32> -> vector<8x128xf32>
    %c0_12 = arith.constant 0 : index
    %c0_13 = arith.constant 0 : index
    %22 = vector.load %arg5[%c0_12, %c0_13] : memref<1x128xf32, #tpu.memory_space<vmem>>, vector<1x128xf32>
    %23 = vector.broadcast %22 : vector<1x128xf32> to vector<8x128xf32>
    %24 = arith.addf %21, %23 : vector<8x128xf32>
    %c0_14 = arith.constant 0 : index
    %c0_15 = arith.constant 0 : index
    %25 = vector.load %arg6[%c0_14, %c0_15] : memref<8x128xf32, #tpu.memory_space<vmem>>, vector<8x128xf32>
    tpu.vector_store %arg6[%c0_14, %c0_15], %24 {strides = array<i32>} : memref<8x128xf32, #tpu.memory_space<vmem>>, vector<8x128xf32>,
    return
  }
  func.func @transform_0(%arg0: i32) -> (i32, i32) {
    %c0_i32 = arith.constant 0 : i32
    %c0_i32_0 = arith.constant 0 : i32
    return %arg0, %c0_i32 : i32, i32
  }
  func.func @transform_1(%arg0: i32) -> (i32, i32) {
    %c0_i32 = arith.constant 0 : i32
    %c0_i32_0 = arith.constant 0 : i32
    %c0_i32_1 = arith.constant 0 : i32
    return %c0_i32, %c0_i32_0 : i32, i32
  }
  func.func @transform_2(%arg0: i32) -> (i32, i32) {
    %c0_i32 = arith.constant 0 : i32
    %c0_i32_0 = arith.constant 0 : i32
    %c0_i32_1 = arith.constant 0 : i32
    return %c0_i32, %c0_i32_0 : i32, i32
  }
  func.func @transform_3(%arg0: i32) -> (i32, i32) {
    %c0_i32 = arith.constant 0 : i32
    %c0_i32_0 = arith.constant 0 : i32
    %c0_i32_1 = arith.constant 0 : i32
    return %c0_i32, %c0_i32_0 : i32, i32
  }
  func.func @transform_4(%arg0: i32) -> (i32, i32) {
    %c0_i32 = arith.constant 0 : i32
    %c0_i32_0 = arith.constant 0 : i32
    %c0_i32_1 = arith.constant 0 : i32
    return %c0_i32, %c0_i32_0 : i32, i32
  }
  func.func @transform_5(%arg0: i32) -> (i32, i32) {
    %c0_i32 = arith.constant 0 : i32
    %c0_i32_0 = arith.constant 0 : i32
    return %arg0, %c0_i32 : i32, i32
  }
}

</mosaic_0001>

<bundles_post_ra>
// kernel: tpu_custom_call.1
= control target key start
LH: loop header
LB: loop body
LE: loop exit
PB: predicated region body
PF: predicated region fallthrough
CT: control target
= control target key end

     0   :  { %10 = vsyncpa [#allocation3], 0  ;;  %s1775_s0 = inlined_call_operand.hbm [shape: f32[16,128], index: 0, kind: input, shape index: {}]   ;;  %s1776_s1 = inlined_call_operand.hbm [shape: bf16[128,512], index: 1, kind: input, shape index: {}]   ;;  %s1777_s2 = inlined_call_operand.vmem [shape: f32[1,512], index: 2, kind: input, shape index: {}]   ;;  %s1778_s3 = inlined_call_operand.hbm [shape: bf16[512,128], index: 3, kind: input, shape index: {}]   ;;  %s1779_s4 = inlined_call_operand.vmem [shape: f32[1,128], index: 4, kind: input, shape index: {}]   ;;  %s1780_s5 = inlined_call_operand.hbm [shape: f32[16,128], index: 5, kind: output, shape index: {}]  }
   0x1   :  { %12 = vsyncpa [#allocation3 + $0x1], 0 }
   0x2   :  { %13 = vsyncpa [#allocation6], 0 }
   0x3   :  { %14 = vsyncpa [#allocation4], 0 }
   0x4   :  { %16 = vsyncpa [#allocation4 + $0x1], 0  ;;  %s1533_s18 = smov 0   ;;  %s1535_s19 = smov 0  }
   0x5   :  { %s1537_s20 = smov 0   ;;  %s1539_s21 = smov 0  }
   0x6 LB: > { %s1554_s22 = sadd.s32 4294967295, %s1492_s21   ;;  %s1051_s23 = sadd.s32 4294967294, %s1492_s21   ;;  %s1492_s21 = sphi %s1539_s21, %s1800_s21   ;;  %s1488_s20 = sphi %s1537_s20, %s1799_s20   ;;  %s1484_s19 = sphi %s1535_s19, %s1798_s19   ;;  %s1480_s18 = sphi %s1533_s18, %s1797_s18  }
   0x7   : > { %p42_p0 = scmp.ne.s32.totalorder %s1484_s19, %s1480_s18  ;;  %p1781_p1 = scmp.eq.s32.totalorder %s1554_s22, 0 }
   0x8   : > { %p156_p3 = scmp.eq.s32.totalorder %s1051_s23, 1  ;;  %p1052_p5 = scmp.ge.s32.totalorder %s1492_s21, 1 }
   0x9   : > { %p1563_p4 = por %p1781_p1, %p42_p0  ;;  %p163_p7 = scmp.lt.s32.totalorder %s1492_s21, 3 }
   0xa   : > { %p1568_p6 = por %p156_p3, %p42_p0  ;;  %s1494_s27 = smov [#allocation5]  }
   0xb   : > { %s1784_s24 = scalar_select %p1563_p4, 1, 0 }
   0xc   : > { %s1785_s25 = scalar_select %p1568_p6, 1, 0 }
   0xd   : > { %p1573_p8 = pnand %p1052_p5, %p163_p7  ;;  %s175_s28 = sshll.u32 %s1494_s27, 4  ;;  %s1577_s28 = int_to_ptr.vmem [resolvable:$true] %s175_s28 }
   0xe   : > { %s1495_s30 = smov [#allocation7]   ;;  %s1336_s9 = scalar_lea.hbm %s1776_s1, 4096 }
   0xf   : > { %p1188_p9 = pneg %p1573_p8  ;;  %s191_s6 = sshll.u32 %s1495_s30, 4  ;;  %s1588_s6 = int_to_ptr.vmem [resolvable:$true] %s191_s6 }
  0x10   : > { %p1337_p12 = scmp.ne.s32.totalorder %s1776_s1, %s1336_s9  ;;  %p1343_p5 = scmp.lt.u32.totalorder %s1336_s9, %s1776_s1 }
  0x11   : > { %p1584_p11 = pnand %p1188_p9, %p1781_p1 }
  0x13   : > { %p1338_p13 = pneg %p1584_p11 }
  0x15   : > { %p1339_p0 = pnand %p1338_p13, %p1337_p12 }
  0x17   : > { %p1340_p3 = pneg %p1339_p0 }
  0x19   : > { %p1345_p7 = pnand %p1343_p5, %p1340_p3 }
  0x1b   : > { %1348 = shalt.err (!%p1345_p7)
}
  0x1c   : > { %s1349_s14 = scalar_lea.vmem %s1577_s28, 4096  ;;  %p1357_p2 = scmp.lt.s32.totalorder %s1577_s28, %s1577_s28 }
  0x1d   : > { %p1350_p9 = scmp.ne.s32.totalorder %s1577_s28, %s1349_s14  ;;  %p1358_p12 = scmp.lt.s32.totalorder %s1349_s14, %s1349_s14 }
  0x1f   : > { %p1352_p10 = pnand %p1350_p9, %p1338_p13  ;;  %p1359_p0 = por %p1358_p12, %p1357_p2 }
  0x21   : > { %p1353_p1 = pneg %p1352_p10 }
  0x23   : > { %p1360_p6 = pnand %p1359_p0, %p1353_p1 }
  0x25   : > { %1363 = shalt.err (!%p1360_p6)
}
  0x26   : > { %s1496_s15 = smov 256   ;;  %s1497_s16 = smov 16  }
  0x27   : > { %1191 = dma.hbm_to_vmem [thread:$0]  (!%p1584_p11), %s1776_s1, 4096, %s1577_s28, [#allocation6], %s1496_s15, %s1496_s15, %s1497_s16  }
  0x28   : > { %s1364_s7 = scalar_lea.hbm %s1778_s3, 4096 }
  0x29   : > { %p1365_p2 = scmp.ne.s32.totalorder %s1778_s3, %s1364_s7  ;;  %p1371_p10 = scmp.lt.u32.totalorder %s1364_s7, %s1778_s3 }
  0x2b   : > { %p1367_p1 = pnand %p1365_p2, %p1338_p13 }
  0x2d   : > { %p1368_p6 = pneg %p1367_p1 }
  0x2f   : > { %p1373_p3 = pnand %p1371_p10, %p1368_p6 }
  0x31   : > { %1376 = shalt.err (!%p1373_p3)
}
  0x32   : > { %s1377_s28 = scalar_lea.vmem %s1588_s6, 4096  ;;  %p1385_p12 = scmp.lt.s32.totalorder %s1588_s6, %s1588_s6 }
  0x33   : > { %p1378_p5 = scmp.ne.s32.totalorder %s1588_s6, %s1377_s28  ;;  %p1386_p0 = scmp.lt.s32.totalorder %s1377_s28, %s1377_s28 }
  0x35   : > { %p1380_p7 = pnand %p1378_p5, %p1338_p13  ;;  %p1387_p2 = por %p1386_p0, %p1385_p12 }
  0x37   : > { %p1381_p9 = pneg %p1380_p7 }
  0x39   : > { %p1388_p1 = pnand %p1387_p2, %p1381_p9 }
  0x3b   : > { %1391 = shalt.err (!%p1388_p1)
}
  0x3c   : > { %s1498_s12 = smov 64   ;;  %s1499_s13 = smov 4  }
  0x3d   : > { %1194 = dma.hbm_to_vmem [thread:$0]  (!%p1584_p11), %s1778_s3, 4096, %s1588_s6, [#allocation6], %s1498_s12, %s1498_s12, %s1499_s13  }
  0x3e   : > { %s1643_s16 = sadd.s32 1, %s1492_s21   ;;  %s29_s23 = sadd.s32 1, %s1488_s20 }
  0x3f   : > { %s26_s17 = ssub.s32 %s1492_s21, %s1643_s16  ;;  %p36_p6 = scmp.ne.s32.totalorder %s1488_s20, %s1484_s19 }
  0x40   : > { %p27_p13 = scmp.eq.s32.totalorder %s26_s17, 0  ;;  %p37_p10 = scmp.eq.s32.totalorder %s1492_s21, 0 }
  0x41   : > { %p1788_p5 = scmp.eq.s32.totalorder %s1554_s22, 1  ;;  %p1205_p9 = scmp.lt.s32.totalorder %s1492_s21, 2 }
  0x42   : > { %s1652_s27 = scalar_select %p27_p13, %s1488_s20, %s29_s23  }
  0x43   : > { %p38_p3 = por %p37_p10, %p36_p6  ;;  %p1656_p7 = por %p1788_p5, %p36_p6 }
  0x44   : > { %s208_s29 = sand.u32 1, %s1488_s20   ;;  %s1057_s6 = sshll.u32 %s1492_s21, 7 }
  0x45   : > { %s1789_s30 = scalar_select %p1656_p7, 1, 0 }
  0x46   : > { %s1056_s7 = sshll.u32 %s208_s29, 3  ;;  %s1666_s10 = scalar_lea.hbm %s1775_s0, %s1057_s6 }
  0x47   : > { %s212_s11 = scalar_lea.vmem [#allocation2], %s1056_s7  ;;  %p1670_p11 = pnand %p1205_p9, %p38_p3 }
  0x48   : > { %s219_s28 = sshll.u32 %s212_s11, 4  ;;  %s209_s13 = scalar_lea.sflag [#allocation3], %s208_s29  ;;  %s1668_s28 = int_to_ptr.vmem [resolvable:$true] %s219_s28 }
  0x49   : > { %s1392_s14 = scalar_lea.hbm %s1666_s10, 128  ;;  %p1394_p0 = pneg %p1670_p11 }
  0x4a   : > { %p1393_p12 = scmp.ne.s32.totalorder %s1666_s10, %s1392_s14  ;;  %s1397_s23 = scalar_lea.hbm %s1775_s0, 256 }
  0x4b   : > { %p1398_p13 = scmp.lt.u32.totalorder %s1666_s10, %s1775_s0  ;;  %p1399_p6 = scmp.lt.u32.totalorder %s1397_s23, %s1392_s14 }
  0x4c   : > { %p1395_p2 = pnand %p1394_p0, %p1393_p12  ;;  %p1401_p3 = scmp.lt.u32.totalorder %s1392_s14, %s1666_s10 }
  0x4d   : > { %p1400_p10 = por %p1399_p6, %p1398_p13 }
  0x4e   : > { %p1396_p1 = pneg %p1395_p2 }
  0x4f   : > { %p1402_p5 = por %p1401_p3, %p1400_p10 }
  0x51   : > { %p1403_p9 = pnand %p1402_p5, %p1396_p1 }
  0x53   : > { %1406 = shalt.err (!%p1403_p9)
}
  0x54   : > { %s1407_s29 = scalar_lea.vmem %s1668_s28, 128  ;;  %s1500_s8 = smov [#allocation2]  }
  0x55   : > { %p1408_p12 = scmp.ne.s32.totalorder %s1668_s28, %s1407_s29  ;;  %s1412_s9 = sshll.u32 %s1500_s8, 4  ;;  %s1413_s9 = int_to_ptr.vmem [resolvable:$false] %s1412_s9 }
  0x56   : > { %s1414_s11 = scalar_lea.vmem %s1413_s9, 256  ;;  %p1415_p4 = scmp.lt.s32.totalorder %s1668_s28, %s1413_s9 }
  0x57   : > { %p1410_p2 = pnand %p1408_p12, %p1394_p0  ;;  %p1416_p13 = scmp.lt.s32.totalorder %s1414_s11, %s1407_s29 }
  0x59   : > { %p1411_p7 = pneg %p1410_p2  ;;  %p1417_p6 = por %p1416_p13, %p1415_p4 }
  0x5b   : > { %p1418_p10 = pnand %p1417_p6, %p1411_p7 }
  0x5d   : > { %1421 = shalt.err (!%p1418_p10)
}
  0x5e   : > { %1198 = dma.hbm_to_vmem [thread:$0]  (!%p1670_p11), %s1666_s10, 128, %s1668_s28, %s209_s13  }
  0x5f   : > { %228 = sbr.rel (%p1573_p8) target bundleno = 615 (0x267), region = 40  ;;  %s1702_s14 = sand.u32 (!%p1573_p8), 1, %s1484_s19  }
  0x60   : > { %s1059_s15 = sshll.u32 (!%p1573_p8), %s1702_s14, 3  ;;  %s231_s17 = scalar_lea.sflag (!%p1573_p8), [#allocation3], %s1702_s14 }
  0x61   : > { %s1708_s23 = scalar_lea.vmem (!%p1573_p8), [#allocation2], %s1059_s15  ;;  %p1791_p4 = scmp.ne.s32.totalorder (!%p1573_p8), %s1784_s24, 0 }
  0x66   : > { %1467 = dma.done.wait (%p1791_p4), %s231_s17, 128  }
  0x67   : > { %1469 = vsyncadd (%p1791_p4), %s231_s17, 4294967168  ;;  %p1792_p7 = scmp.eq.s32.totalorder %s1554_s22, 0 }
  0x69   : > { %1471 = dma.done.wait (%p1792_p7), [#allocation6], 8192   ;;  %p1793_p8 = pmov %p1792_p7 }
  0x6a   : > { %v1501_v0 = vmov 0   ;;  %v1248_v1 = vld [vmem:[#allocation5 + $0x4] ss:$16 sps:$4 sm:$0xff]   ;;  %v1250_v2 = vld [vmem:[#allocation5 + $0xc] ss:$16 sps:$4 sm:$0xff]   ;;  %s1129_s12 = sshll.u32 %s1554_s22, 7 }
  0x6b   : > { %1473 = vsyncadd (%p1793_p8), [#allocation6], 4294959104  ;;  %518 = vmatprep.mubr.bf16.mxu0 %v1501_v0  ;;  %559 = vmatprep.mubr.bf16.mxu1 %v1501_v0  ;;  %v1252_v3 = vld [vmem:[#allocation5] ss:$16 sps:$4 sm:$0xff]   ;;  %v1253_v4 = vld [vmem:[#allocation5 + $0x8] ss:$16 sps:$4 sm:$0xff]   ;;  %s1731_s8 = scalar_lea.hbm %s1780_s5, %s1129_s12 }
  0x6c   : > { %486 = vmatprep.subr.bf16.mxu0 %v1248_v1  ;;  %527 = vmatprep.subr.bf16.mxu1 %v1250_v2  ;;  %v1254_v5 = vld [vmem:[#allocation5 + $0x24] ss:$16 sps:$4 sm:$0xff]   ;;  %v1256_v6 = vld [vmem:[#allocation5 + $0x2c] ss:$16 sps:$4 sm:$0xff]   ;;  %v1258_v7 = vld [vmem:[#allocation5 + $0x20] ss:$16 sps:$4 sm:$0xff]  }
  0x6d   : > { %487 = vmatpush1.bf16.msra.mxu0 %v1252_v3  ;;  %528 = vmatpush1.bf16.msra.mxu1 %v1253_v4  ;;  %v1259_v8 = vld [vmem:[#allocation5 + $0x28] ss:$16 sps:$4 sm:$0xff]   ;;  %v1260_v9 = vld [vmem:[#allocation5 + $0x44] ss:$16 sps:$4 sm:$0xff]   ;;  %v1262_v10 = vld [vmem:[#allocation5 + $0x4c] ss:$16 sps:$4 sm:$0xff]   ;;  %v306_v3 = vlaneseq }
  0x6e   : > { %488 = vmatprep.subr.bf16.mxu0 %v1254_v5  ;;  %529 = vmatprep.subr.bf16.mxu1 %v1256_v6  ;;  %v1264_v11 = vld [vmem:[#allocation5 + $0x40] ss:$16 sps:$4 sm:$0xff]   ;;  %v1265_v12 = vld [vmem:[#allocation5 + $0x48] ss:$16 sps:$4 sm:$0xff]   ;;  %v1266_v13 = vld [vmem:[#allocation5 + $0x64] ss:$16 sps:$4 sm:$0xff]  }
  0x6f   : > { %v1268_v14 = vld [vmem:[#allocation5 + $0x6c] ss:$16 sps:$4 sm:$0xff]   ;;  %v1270_v15 = vld [vmem:[#allocation5 + $0x60] ss:$16 sps:$4 sm:$0xff]   ;;  %v1271_v16 = vld [vmem:[#allocation5 + $0x68] ss:$16 sps:$4 sm:$0xff]  }
  0x70   : > { %v1272_v17 = vld [vmem:[#allocation5 + $0x84] ss:$16 sps:$4 sm:$0xff]   ;;  %v1274_v18 = vld [vmem:[#allocation5 + $0x8c] ss:$16 sps:$4 sm:$0xff]   ;;  %v1276_v19 = vld [vmem:[#allocation5 + $0x80] ss:$16 sps:$4 sm:$0xff]  }
  0x71   : > { %489 = vmatpush1.bf16.msra.mxu0 %v1258_v7  ;;  %530 = vmatpush1.bf16.msra.mxu1 %v1259_v8  ;;  %v1277_v20 = vld [vmem:[#allocation5 + $0x88] ss:$16 sps:$4 sm:$0xff]   ;;  %v1278_v21 = vld [vmem:[#allocation5 + $0xa4] ss:$16 sps:$4 sm:$0xff]   ;;  %v1280_v22 = vld [vmem:[#allocation5 + $0xac] ss:$16 sps:$4 sm:$0xff]  }
  0x72   : > { %490 = vmatprep.subr.bf16.mxu0 %v1260_v9  ;;  %531 = vmatprep.subr.bf16.mxu1 %v1262_v10  ;;  %v1282_v23 = vld [vmem:[#allocation5 + $0xa0] ss:$16 sps:$4 sm:$0xff]   ;;  %v1283_v24 = vld [vmem:[#allocation5 + $0xa8] ss:$16 sps:$4 sm:$0xff]   ;;  %v1284_v25 = vld [vmem:[#allocation5 + $0xc4] ss:$16 sps:$4 sm:$0xff]  }
  0x73   : > { %v1286_v26 = vld [vmem:[#allocation5 + $0xcc] ss:$16 sps:$4 sm:$0xff]   ;;  %v1288_v27 = vld [vmem:[#allocation5 + $0xc0] ss:$16 sps:$4 sm:$0xff]   ;;  %v1289_v28 = vld [vmem:[#allocation5 + $0xc8] ss:$16 sps:$4 sm:$0xff]  }
  0x74   : > { %v1290_v29 = vld [vmem:[#allocation5 + $0xe4] ss:$16 sps:$4 sm:$0xff]   ;;  %v1292_v30 = vld [vmem:[#allocation5 + $0xec] ss:$16 sps:$4 sm:$0xff]   ;;  %v1294_v31 = vld [vmem:[#allocation5 + $0xe0] ss:$16 sps:$4 sm:$0xff]  }
  0x75   : > { %491 = vmatpush1.bf16.msra.mxu0 %v1264_v11  ;;  %532 = vmatpush1.bf16.msra.mxu1 %v1265_v12  ;;  %v1295_v32 = vld [vmem:[#allocation5 + $0xe8] ss:$16 sps:$4 sm:$0xff]   ;;  %v1296_v34 = vld [vmem:[#allocation7 + $0x40] sm:$0xff]   ;;  %v1304_v43 = vld [vmem:[#allocation7 + $0x50] sm:$0xff]   ;;  %v307_v4 = vshrl.u32 %v306_v3, 7  ;;  %s268_s13 = scalar_lea.vmem [#allocation8], %s1059_s15 }
  0x76   : > { %492 = vmatprep.subr.bf16.mxu0 %v1266_v13  ;;  %533 = vmatprep.subr.bf16.mxu1 %v1268_v14  ;;  %v270_v33 = vld [vmem:[%s1708_s23] sm:$0xff]  ;;  %v1297_v35 = vld [vmem:[#allocation7 + $0xc0] sm:$0xff]   ;;  %v1300_v39 = vld [vmem:[#allocation7 + $0x48] sm:$0xff]   ;;  %s962_s7 = sshll.u32 %s268_s13, 4  ;;  %s949_s9 = scalar_lea.sflag [#allocation4], %s1702_s14  ;;  %s1733_s7 = int_to_ptr.vmem [resolvable:$true] %s962_s7 }
  0x77   : > { %v1298_v36 = vld [vmem:[#allocation7] sm:$0xff]   ;;  %v271_v38 = vpack.c.bf16 %v270_v33, %v270_v33  ;;  %v1301_v40 = vld [vmem:[#allocation7 + $0xc8] sm:$0xff]   ;;  %v1305_v44 = vld [vmem:[#allocation7 + $0xd0] sm:$0xff]   ;;  %v308_v5 = vsub.s32 0, %v307_v4  ;;  %v316_v6 = vsub.s32 2, %v307_v4  ;;  %v312_v8 = vsub.s32 1, %v307_v4 }
  0x78   : > { %v1299_v37 = vld [vmem:[#allocation7 + $0x80] sm:$0xff]   ;;  %v1302_v41 = vld [vmem:[#allocation7 + $0x8] sm:$0xff]   ;;  %v1306_v45 = vld [vmem:[#allocation7 + $0x10] sm:$0xff]   ;;  %v320_v9 = vsub.s32 3, %v307_v4  ;;  %s1422_s11 = scalar_lea.vmem %s1733_s7, 128  ;;  %p1794_p0 = scmp.ne.s32.totalorder %s1789_s30, 0 }
  0x79   : > { %493 = vmatpush1.bf16.msra.mxu0 %v1270_v15  ;;  %534 = vmatpush1.bf16.msra.mxu1 %v1271_v16  ;;  %v1303_v42 = vld [vmem:[#allocation7 + $0x88] sm:$0xff]   ;;  %v1307_v46 = vld [vmem:[#allocation7 + $0x90] sm:$0xff]   ;;  %v1308_v47 = vld [vmem:[#allocation7 + $0x58] sm:$0xff]   ;;  %p1423_p11 = scmp.ne.s32.totalorder %s1733_s7, %s1422_s11  ;;  %s1502_s22 = smov [#allocation8]  }
  0x7a   : > { %494 = vmatprep.subr.bf16.mxu0 %v1272_v17  ;;  %535 = vmatprep.subr.bf16.mxu1 %v1274_v18  ;;  %v1309_v48 = vld [vmem:[#allocation7 + $0xd8] sm:$0xff]   ;;  %v1312_v51 = vld [vmem:[#allocation7 + $0x60] sm:$0xff]   ;;  %v1316_v55 = vld [vmem:[#allocation7 + $0x68] sm:$0xff]   ;;  %s1426_s15 = sshll.u32 %s1502_s22, 4  ;;  %s1427_s15 = int_to_ptr.vmem [resolvable:$false] %s1426_s15 }
  0x7b   : > { %v1310_v49 = vld [vmem:[#allocation7 + $0x18] sm:$0xff]   ;;  %v1313_v52 = vld [vmem:[#allocation7 + $0xe0] sm:$0xff]   ;;  %v1317_v56 = vld [vmem:[#allocation7 + $0xe8] sm:$0xff]   ;;  %p1424_p1 = pnand %p1423_p11, %p1794_p0  ;;  %s1428_s17 = scalar_lea.vmem %s1427_s15, 256 }
  0x7c   : > { %v1311_v50 = vld [vmem:[#allocation7 + $0x98] sm:$0xff]   ;;  %v1314_v53 = vld [vmem:[#allocation7 + $0x20] sm:$0xff]   ;;  %v1318_v57 = vld [vmem:[#allocation7 + $0x28] sm:$0xff]   ;;  %p1429_p5 = scmp.lt.s32.totalorder %s1733_s7, %s1427_s15  ;;  %p1430_p9 = scmp.lt.s32.totalorder %s1428_s17, %s1422_s11 }
  0x7d   : > { %495 = vmatpush1.bf16.msra.mxu0 %v1276_v19  ;;  %536 = vmatpush1.bf16.msra.mxu1 %v1277_v20  ;;  %v1315_v54 = vld [vmem:[#allocation7 + $0xa0] sm:$0xff]   ;;  %v1319_v58 = vld [vmem:[#allocation7 + $0xa8] sm:$0xff]   ;;  %v1320_v59 = vld [vmem:[#allocation7 + $0x70] sm:$0xff]   ;;  %p1425_p3 = pneg %p1424_p1 }
  0x7e   : > { %496 = vmatprep.subr.bf16.mxu0 %v1278_v21  ;;  %537 = vmatprep.subr.bf16.mxu1 %v1280_v22  ;;  %v1321_v60 = vld [vmem:[#allocation7 + $0xf0] sm:$0xff]   ;;  %v1324_v63 = vld [vmem:[#allocation7 + $0x78] sm:$0xff]   ;;  %p1431_p12 = por %p1430_p9, %p1429_p5 }
  0x7f   : > { %v1322_v61 = vld [vmem:[#allocation7 + $0x30] sm:$0xff]   ;;  %v1325_v0 = vld [vmem:[#allocation7 + $0xf8] sm:$0xff]  }
  0x80   : > { %v1323_v62 = vld [vmem:[#allocation7 + $0xb0] sm:$0xff]   ;;  %v1326_v1 = vld [vmem:[#allocation7 + $0x38] sm:$0xff]   ;;  %p1432_p2 = pnand %p1431_p12, %p1425_p3 }
  0x81   : > { %497 = vmatpush1.bf16.msra.mxu0 %v1282_v23  ;;  %538 = vmatpush1.bf16.msra.mxu1 %v1283_v24  ;;  %v1327_v2 = vld [vmem:[#allocation7 + $0xb8] sm:$0xff]   ;;  %v304_v7 = vld [vmem:[%s1777_s2] sm:$0xf] }
  0x82   : > { %498 = vmatprep.subr.bf16.mxu0 %v1284_v25  ;;  %539 = vmatprep.subr.bf16.mxu1 %v1286_v26  ;;  %v309_v10 = vrot.slane %v304_v7, %v308_v5  ;;  %v317_v11 = vrot.slane %v304_v7, %v316_v6  ;;  %v313_v12 = vrot.slane %v304_v7, %v312_v8 }
  0x83   : > { %v321_v13 = vrot.slane %v304_v7, %v320_v9 }
  0x85   : > { %499 = vmatpush1.bf16.msra.mxu0 %v1288_v27  ;;  %540 = vmatpush1.bf16.msra.mxu1 %v1289_v28 }
  0x86   : > { %500 = vmatprep.subr.bf16.mxu0 %v1290_v29  ;;  %541 = vmatprep.subr.bf16.mxu1 %v1292_v30 }
  0x89   : > { %501 = vmatpush1.bf16.msra.mxu0 %v1294_v31  ;;  %542 = vmatpush1.bf16.msra.mxu1 %v1295_v32 }
  0x8a   : > { %1132 = vmatprep.subr.bf16.mxu0 %v1296_v34  ;;  %1154 = vmatprep.subr.bf16.mxu1 %v1297_v35 }
  0x8c   : > { %519 = vmatmul.mubr.bf16.vlgmr.msra.gmra.mrb[0].mxu0 %v271_v38  ;;  %560 = vmatmul.mubr.bf16.vlgmr.msra.gmra.mrb[0].mxu1 %v271_v38 }
  0x8d   : > { %1133 = vmatpush3.bf16.msra.mxu0 %v1298_v36  ;;  %1155 = vmatpush3.bf16.msra.mxu1 %v1299_v37 }
  0x8e   : > { %1134 = vmatprep.subr.bf16.mxu0 %v1300_v39  ;;  %1156 = vmatprep.subr.bf16.mxu1 %v1301_v40 }
  0x91   : > { %1135 = vmatpush3.bf16.msra.mxu0 %v1302_v41  ;;  %1157 = vmatpush3.bf16.msra.mxu1 %v1303_v42 }
  0x92   : > { %1136 = vmatprep.subr.bf16.mxu0 %v1304_v43  ;;  %1158 = vmatprep.subr.bf16.mxu1 %v1305_v44 }
  0x95   : > { %1137 = vmatpush3.bf16.msra.mxu0 %v1306_v45  ;;  %1159 = vmatpush3.bf16.msra.mxu1 %v1307_v46 }
  0x96   : > { %1138 = vmatprep.subr.bf16.mxu0 %v1308_v47  ;;  %1160 = vmatprep.subr.bf16.mxu1 %v1309_v48 }
  0x99   : > { %1139 = vmatpush3.bf16.msra.mxu0 %v1310_v49  ;;  %1161 = vmatpush3.bf16.msra.mxu1 %v1311_v50 }
  0x9a   : > { %1140 = vmatprep.subr.bf16.mxu0 %v1312_v51  ;;  %1162 = vmatprep.subr.bf16.mxu1 %v1313_v52 }
  0x9d   : > { %1141 = vmatpush3.bf16.msra.mxu0 %v1314_v53  ;;  %1163 = vmatpush3.bf16.msra.mxu1 %v1315_v54 }
  0x9e   : > { %1142 = vmatprep.subr.bf16.mxu0 %v1316_v55  ;;  %1164 = vmatprep.subr.bf16.mxu1 %v1317_v56 }
  0xa1   : > { %1143 = vmatpush3.bf16.msra.mxu0 %v1318_v57  ;;  %1165 = vmatpush3.bf16.msra.mxu1 %v1319_v58 }
  0xa2   : > { %1144 = vmatprep.subr.bf16.mxu0 %v1320_v59  ;;  %1166 = vmatprep.subr.bf16.mxu1 %v1321_v60 }
  0xa5   : > { %1145 = vmatpush3.bf16.msra.mxu0 %v1322_v61  ;;  %1167 = vmatpush3.bf16.msra.mxu1 %v1323_v62 }
  0xa6   : > { %1146 = vmatprep.subr.bf16.mxu0 %v1324_v63  ;;  %1168 = vmatprep.subr.bf16.mxu1 %v1325_v0  ;;  %v1095_v0 = vld [vmem:[%s1779_s4] ss:$0 sm:$0xff] }
  0xa9   : > { %1147 = vmatpush3.bf16.msra.mxu0 %v1326_v1  ;;  %1169 = vmatpush3.bf16.msra.mxu1 %v1327_v2 }
 0x15f   : > { %v520_v14 = vpop.f32.mrb[0].mxu0  ;;  %v561_v15 = vpop.f32.mrb[0].mxu1 }
 0x160   : > { %v521_v16 = vadd.f32 %v520_v14, %v309_v10  ;;  %v562_v17 = vadd.f32 %v561_v15, %v317_v11  ;;  %v522_v18 = vpop.f32.mrb[1].mxu0  ;;  %v563_v19 = vpop.f32.mrb[1].mxu1 }
 0x161   : > { %v523_v20 = vadd.f32 %v522_v18, %v313_v12  ;;  %v564_v21 = vadd.f32 %v563_v19, %v321_v13  ;;  %v524_v22 = vpop.f32.mrb[2].mxu0  ;;  %v565_v23 = vpop.f32.mrb[2].mxu1 }
 0x162   : > { %v568_v24 = vmul.f32 0.035677407, %v521_v16  ;;  %v570_v25 = vmul.f32 0.035677407, %v562_v17  ;;  %v525_v28 = vpop.f32.mrb[3].mxu0  ;;  %v566_v29 = vpop.f32.mrb[3].mxu1 }
 0x163   : > { %v569_v26 = vmul.f32 0.035677407, %v523_v20  ;;  %v571_v27 = vmul.f32 0.035677407, %v564_v21  ;;  %v584_v46 = vmul.f32 0.5, %v521_v16  ;;  %v586_v49 = vmul.f32 0.5, %v562_v17 }
 0x164   : > { %v572_v30 = vmul.f32 %v568_v24, %v521_v16  ;;  %v574_v31 = vmul.f32 %v570_v25, %v562_v17  ;;  %v585_v50 = vmul.f32 0.5, %v523_v20  ;;  %v587_v52 = vmul.f32 0.5, %v564_v21 }
 0x165   : > { %v573_v32 = vmul.f32 %v569_v26, %v523_v20  ;;  %v575_v33 = vmul.f32 %v571_v27, %v564_v21 }
 0x166   : > { %v576_v34 = vadd.f32 0.7978846, %v572_v30  ;;  %v578_v35 = vadd.f32 0.7978846, %v574_v31 }
 0x167   : > { %v577_v36 = vadd.f32 0.7978846, %v573_v32  ;;  %v579_v37 = vadd.f32 0.7978846, %v575_v33 }
 0x168   : > { %v580_v38 = vmul.f32 %v576_v34, %v521_v16  ;;  %v582_v39 = vmul.f32 %v578_v35, %v562_v17 }
 0x169   : > { %v581_v40 = vmul.f32 %v577_v36, %v523_v20  ;;  %v583_v41 = vmul.f32 %v579_v37, %v564_v21 }
 0x16a   : > { %1328 = vtanh.f32 %v580_v38 }
 0x16b   : > { %1330 = vtanh.f32 %v582_v39 }
 0x16c   : > { %1332 = vtanh.f32 %v581_v40 }
 0x16d   : > { %1334 = vtanh.f32 %v583_v41 }
 0x174   : > { %v1329_v42 = vpop.eup %1328 }
 0x175   : > { %v1331_v43 = vpop.eup %1330  ;;  %v592_v44 = vadd.f32 1.0, %v1329_v42 }
 0x176   : > { %v1333_v45 = vpop.eup %1332  ;;  %v594_v47 = vadd.f32 1.0, %v1331_v43 }
 0x177   : > { %v1335_v48 = vpop.eup %1334  ;;  %v593_v51 = vadd.f32 1.0, %v1333_v45  ;;  %v596_v54 = vmul.f32 %v592_v44, %v584_v46 }
 0x178   : > { %v595_v53 = vadd.f32 1.0, %v1335_v48  ;;  %v598_v56 = vmul.f32 %v594_v47, %v586_v49 }
 0x179   : > { %v597_v55 = vmul.f32 %v593_v51, %v585_v50  ;;  %v600_v60 = vpack.c.bf16 %v596_v54, %v596_v54 }
 0x17a   : > { %v599_v57 = vmul.f32 %v595_v53, %v587_v52  ;;  %v602_v61 = vpack.c.bf16 %v598_v56, %v598_v56 }
 0x17b   : > { %v601_v58 = vpack.c.bf16 %v597_v55, %v597_v55 }
 0x17c   : > { %v603_v59 = vpack.c.bf16 %v599_v57, %v599_v57 }
 0x17d   : > { %899 = vmatprep.mubr.bf16.mxu0 %v601_v58 }
 0x17e   : > { %939 = vmatprep.mubr.bf16.mxu1 %v603_v59  ;;  %900 = vmatmul.mubr.bf16.vlgmr.msra.gmra.mrb[4].mxu0 %v600_v60 }
 0x17f   : > { %940 = vmatmul.mubr.bf16.vlgmr.msra.gmra.mrb[4].mxu1 %v602_v61 }
 0x251   : > { %v1148_v62 = vpop.f32.mrb[4].mxu0 }
 0x252   : > { %v1170_v63 = vpop.f32.mrb[4].mxu1  ;;  %v1149_v1 = vpop.f32.mrb[5].mxu0 }
 0x253   : > { %v1150_v2 = vadd.f32 %v1149_v1, %v1148_v62  ;;  %v1171_v3 = vpop.f32.mrb[5].mxu1  ;;  %v1151_v4 = vpop.f32.mrb[6].mxu0 }
 0x254   : > { %v1172_v5 = vadd.f32 %v1171_v3, %v1170_v63  ;;  %v1173_v6 = vpop.f32.mrb[6].mxu1  ;;  %v1152_v7 = vpop.f32.mrb[7].mxu0 }
 0x255   : > { %v902_v8 = vadd.f32 %v1150_v2, %v1095_v0  ;;  %v1174_v9 = vpop.f32.mrb[7].mxu1 }
 0x257   : > { %v942_v10 = vadd.f32 %v1172_v5, %v902_v8 }
 0x259   : > { %947 = vst [vmem:[%s268_s13] sm:$0xff] %v942_v10 }
 0x25a   : > { %1435 = shalt.err (!%p1432_p2)
}
 0x25b   : > { %s1436_s14 = scalar_lea.hbm %s1731_s8, 128  ;;  %s1440_s26 = scalar_lea.hbm %s1780_s5, 256 }
 0x25c   : > { %p1437_p13 = scmp.ne.s32.totalorder %s1731_s8, %s1436_s14  ;;  %p1441_p4 = scmp.lt.u32.totalorder %s1731_s8, %s1780_s5 }
 0x25d   : > { %p1442_p7 = scmp.lt.u32.totalorder %s1440_s26, %s1436_s14  ;;  %p1444_p11 = scmp.lt.u32.totalorder %s1436_s14, %s1731_s8 }
 0x25e   : > { %p1438_p6 = pnand %p1437_p13, %p1794_p0 }
 0x25f   : > { %p1443_p8 = por %p1442_p7, %p1441_p4 }
 0x260   : > { %p1439_p10 = pneg %p1438_p6 }
 0x261   : > { %p1445_p1 = por %p1444_p11, %p1443_p8 }
 0x263   : > { %p1446_p3 = pnand %p1445_p1, %p1439_p10 }
 0x265   : > { %1449 = shalt.err (!%p1446_p3)
}
 0x266   : > { %1186 = dma.vmem_to_hbm [thread:$0]  (%p1794_p0), %s1733_s7, 128, %s1731_s8, %s949_s9  }
 0x267 PF: > { %s974_s12 = sand.u32 1, %s1480_s18   ;;  %p1795_p5 = scmp.ne.s32.totalorder %s1785_s25, 0 }
 0x268   : > { %p1796_p9 = scmp.ge.s32.totalorder %s1492_s21, 2  ;;  %s975_s13 = scalar_lea.sflag [#allocation4], %s974_s12 }
 0x26a   : > { %p1200_p12 = pnand %p1796_p9, %p1795_p5 }
 0x26c   : > { %1475 = dma.done.wait (!%p1200_p12), %s975_s13, 128  }
 0x26d   : > { %1477 = vsyncadd (!%p1200_p12), %s975_s13, 4294967168  ;;  %p19_p2 = scmp.ge.s32.totalorder %s1643_s16, 4   ;;  %s1797_s18 = smov %s1484_s19 }
 0x26e   : > { %s1798_s19 = smov %s1488_s20  ;;  %s1799_s20 = smov %s1652_s27 }
 0x26f   : > { %s1800_s21 = smov %s1643_s16  ;;  %21 = sbr.rel (!%p19_p2) target bundleno = 6 (0x6), region = 93 }
 0x276   :  { %980 = vsyncpa [#allocation3], 1 }
 0x277   :  { %982 = vsyncpa [#allocation3 + $0x1], 1 }
 0x278   :  { %983 = vsyncpa [#allocation6], 1 }
 0x279   :  { %984 = vsyncpa [#allocation4], 1 }
 0x27a   :  { %986 = vsyncpa [#allocation4 + $0x1], 1 }

</bundles_post_ra>
